<compile_context>
chip_gen: v7x
topology: tpu7x:2x2x1
jax: 0.10.0
libtpu: 0.0.40
codegen_flags: <defaults>
</compile_context>

<pallas_src>
import math

import jax
import jax.numpy as jnp
from jax.experimental import pallas as pl
from jax.experimental.pallas import tpu as pltpu


def make_positional_encoding(d_model: int, max_len: int = 1000,
                             dtype=jnp.float32) -> jnp.ndarray:
    """Build the pe buffer once (matches PyTorch __init__), flat (max_len, d_model),
    pre-cast to the model dtype so the forward pass never slices/casts it."""
    position = jnp.arange(0, max_len, dtype=jnp.float32)[:, None]              # (max_len, 1)
    div_term = jnp.exp(
        jnp.arange(0, d_model, 2, dtype=jnp.float32) * (-math.log(10000.0) / d_model)
    )                                                                           # (ceil(d/2),)
    angles = position * div_term                                                # (max_len, ceil(d/2))
    pe = jnp.zeros((max_len, d_model), dtype=jnp.float32)
    pe = pe.at[:, 0::2].set(jnp.sin(angles))
    pe = pe.at[:, 1::2].set(jnp.cos(angles)[:, : d_model // 2])                 # odd d_model safe
    return pe.astype(dtype)


def _pe_add_kernel(x_ref, pe_ref, o_ref):
    # x_ref / o_ref : (ts, B, D); pe_ref : (ts, 1, D).
    # The batch-axis (sublane) broadcast folds into the VPU add -- no VMEM temp.
    o_ref[...] = x_ref[...] + pe_ref[...]


def _round_up(x: int, m: int) -> int:
    return ((x + m - 1) // m) * m


def _sublanes_for(dtype) -> int:
    # Packed sublane count per vreg: f32 -> 8, bf16 -> 16, int8/fp8 -> 32.
    return 8 * (4 // jnp.dtype(dtype).itemsize)


def _vmem_budget_bytes() -> int:
    """Scoped-VMEM budget: ~half of physical VMEM, capped at 48 MiB.
    v5e/v6e (128 MiB physical) -> 48 MiB; v7x (64 MiB physical) -> 32 MiB."""
    try:
        cap = int(pltpu.get_tpu_info().vmem_capacity_bytes)
    except Exception:
        cap = 64 << 20  # conservative (v7x-sized) fallback
    return max(16 << 20, min(cap // 2, 48 << 20))


def _pick_tile_rows(seq_len: int, x_row_bytes: int, budget_bytes: int,
                    x_data_bytes: int, *, small_bytes: int = 1 << 20,
                    min_steps: int = 4) -> int:
    """Rows of x per block.  Single step for tiny inputs; otherwise ~budget/8-byte
    blocks (2 bufs x (x + out + pe) stays well inside the budget), with at least
    `min_steps` grid steps so a v7x megacore gets >= 2 pipelined steps per core."""
    if x_data_bytes <= small_bytes or seq_len <= 1:
        return seq_len
    target = max(512 << 10, budget_bytes // 8)
    ts = max(1, target // max(x_row_bytes, 1))
    if pl.cdiv(seq_len, ts) < min_steps:
        ts = pl.cdiv(seq_len, min(min_steps, seq_len))
    return min(ts, seq_len)


def positional_encoding_forward(x: jnp.ndarray, pe: jnp.ndarray,
                                *, tile_s: int | None = None,
                                donate_x: bool = False,
                                core_parallel: bool = False) -> jnp.ndarray:
    """x: (S, B, D); pe: (max_len, D) from make_positional_encoding (pre-cast).
    Returns x + pe[:S] broadcast over the batch axis, like the PyTorch forward."""
    S, B, D = x.shape
    max_len, d_model = pe.shape
    assert d_model == D, f"pe d_model {d_model} != x d_model {D}"
    assert S <= max_len, f"sequence length {S} exceeds pe max_len {max_len}"
    if pe.dtype != x.dtype:            # no-op when pe was pre-cast at init
        pe = pe.astype(x.dtype)
    pe3 = pe.reshape(max_len, 1, D)    # free metadata reshape (broadcast source)

    itemsize = jnp.dtype(x.dtype).itemsize
    sub = _sublanes_for(x.dtype)
    # VMEM footprint of one x row, including (sublane, lane) tile padding, so the
    # tile picker never exceeds the budget even for tiny B / D.
    x_row_bytes = _round_up(B, sub) * _round_up(D, 128) * itemsize
    budget = _vmem_budget_bytes()
    ts = tile_s if tile_s is not None else _pick_tile_rows(
        S, x_row_bytes, budget, S * B * D * itemsize)
    grid = (pl.cdiv(S, ts),)           # partial last blocks handled by Pallas

    # "parallel" shards grid steps across TensorCores on megacore parts; flip on
    # core_parallel to force an explicit per-core split of the S axis.
    sem = pltpu.CORE_PARALLEL if core_parallel else "parallel"

    out = pl.pallas_call(
        _pe_add_kernel,
        out_shape=jax.ShapeDtypeStruct((S, B, D), x.dtype),
        grid=grid,
        in_specs=[
            pl.BlockSpec((ts, B, D), lambda i: (i, 0, 0)),   # x slab
            pl.BlockSpec((ts, 1, D), lambda i: (i, 0, 0)),   # pe rows (broadcast over B)
        ],
        out_specs=pl.BlockSpec((ts, B, D), lambda i: (i, 0, 0)),
        compiler_params=pltpu.CompilerParams(
            dimension_semantics=(sem,),
            vmem_limit_bytes=budget,
        ),
        # Footprint-only optimization; requires the caller to donate x under jit.
        input_output_aliases=({0: 0} if donate_x else {}),
    )(x, pe3)
    return out


if __name__ == "__main__":
    d_model = 32
    max_len = 1000
    pe = make_positional_encoding(d_model, max_len, dtype=jnp.float32)
    key = jax.random.PRNGKey(0)

    # Case 1: nominal module shape (seq=8, batch=2, d_model=32) -> single grid step.
    S, B = 8, 2
    x = jax.random.normal(key, (S, B, d_model), dtype=jnp.float32)
    out = jax.block_until_ready(positional_encoding_forward(x, pe))
    ref = x + pe[:S][:, None, :]
    assert out.shape == (S, B, d_model)
    assert jnp.allclose(out, ref, atol=1e-6, rtol=1e-6)

    # Case 2: forced multi-step grid with a partial last x block.
    S2 = 20
    x2 = jax.random.normal(jax.random.PRNGKey(1), (S2, B, d_model), dtype=jnp.float32)
    out2 = jax.block_until_ready(positional_encoding_forward(x2, pe, tile_s=8))
    ref2 = x2 + pe[:S2][:, None, :]
    assert jnp.allclose(out2, ref2, atol=1e-6, rtol=1e-6)

    # Case 3: S == max_len with a tile that does not divide it -> the last pe block
    # is a partial edge block of the pe buffer itself.
    max_len3 = 40
    pe_small = make_positional_encoding(d_model, max_len3, dtype=jnp.float32)
    x3 = jax.random.normal(jax.random.PRNGKey(2), (max_len3, B, d_model),
                           dtype=jnp.float32)
    out3 = jax.block_until_ready(positional_encoding_forward(x3, pe_small, tile_s=16))
    ref3 = x3 + pe_small[:, None, :]
    assert jnp.allclose(out3, ref3, atol=1e-6, rtol=1e-6)

    # Case 4: bf16 activations with a bf16-precast pe table (documented divergence
    # from PyTorch, which keeps pe in float32).
    pe_bf16 = make_positional_encoding(d_model, max_len, dtype=jnp.bfloat16)
    S4 = 24
    x4 = jax.random.normal(jax.random.PRNGKey(3), (S4, B, d_model),
                           dtype=jnp.float32).astype(jnp.bfloat16)
    out4 = jax.block_until_ready(positional_encoding_forward(x4, pe_bf16))
    ref4 = x4 + pe_bf16[:S4][:, None, :]
    assert jnp.allclose(out4.astype(jnp.float32), ref4.astype(jnp.float32),
                        atol=1e-2, rtol=1e-2)

    print("KERNEL_OK")
</pallas_src>

<mosaic_0001>
module attributes {stable_mosaic.version = 11 : i64} {
  func.func @_pe_add_kernel(%arg0: i32, %arg1: memref<8x2x32xf32, #tpu.memory_space<vmem>>, %arg2: memref<8x1x32xf32, #tpu.memory_space<vmem>>, %arg3: memref<8x2x32xf32, #tpu.memory_space<vmem>>) attributes {dimension_semantics = [#tpu.dimension_semantics<parallel>], iteration_bounds = array<i64: 1>, scalar_prefetch = 0 : i64, scratch_operands = 0 : i64, tpu.core_type = #tpu.core_type<tc>, window_params = [{transform_indices = @transform_0, window_bounds = array<i64: 8, 2, 32>}, {transform_indices = @transform_1, window_bounds = array<i64: 8, 1, 32>}, {transform_indices = @transform_2, window_bounds = array<i64: 8, 2, 32>}]} {
    %c0 = arith.constant 0 : index
    %c0_0 = arith.constant 0 : index
    %c0_1 = arith.constant 0 : index
    %0 = vector.load %arg1[%c0, %c0_0, %c0_1] : memref<8x2x32xf32, #tpu.memory_space<vmem>>, vector<8x2x32xf32>
    %c0_2 = arith.constant 0 : index
    %c0_3 = arith.constant 0 : index
    %c0_4 = arith.constant 0 : index
    %1 = vector.load %arg2[%c0_2, %c0_3, %c0_4] : memref<8x1x32xf32, #tpu.memory_space<vmem>>, vector<8x1x32xf32>
    %2 = vector.broadcast %1 : vector<8x1x32xf32> to vector<8x2x32xf32>
    %3 = arith.addf %0, %2 : vector<8x2x32xf32>
    %c0_5 = arith.constant 0 : index
    %c0_6 = arith.constant 0 : index
    %c0_7 = arith.constant 0 : index
    %4 = vector.load %arg3[%c0_5, %c0_6, %c0_7] : memref<8x2x32xf32, #tpu.memory_space<vmem>>, vector<8x2x32xf32>
    tpu.vector_store %arg3[%c0_5, %c0_6, %c0_7], %3 {strides = array<i32>} : memref<8x2x32xf32, #tpu.memory_space<vmem>>, vector<8x2x32xf32>,
    return
  }
  func.func @transform_0(%arg0: i32) -> (i32, i32, i32) {
    %c0_i32 = arith.constant 0 : i32
    %c0_i32_0 = arith.constant 0 : i32
    %c0_i32_1 = arith.constant 0 : i32
    return %arg0, %c0_i32, %c0_i32_0 : i32, i32, i32
  }
  func.func @transform_1(%arg0: i32) -> (i32, i32, i32) {
    %c0_i32 = arith.constant 0 : i32
    %c0_i32_0 = arith.constant 0 : i32
    %c0_i32_1 = arith.constant 0 : i32
    return %arg0, %c0_i32, %c0_i32_0 : i32, i32, i32
  }
  func.func @transform_2(%arg0: i32) -> (i32, i32, i32) {
    %c0_i32 = arith.constant 0 : i32
    %c0_i32_0 = arith.constant 0 : i32
    %c0_i32_1 = arith.constant 0 : i32
    return %arg0, %c0_i32, %c0_i32_0 : i32, i32, i32
  }
}

</mosaic_0001>

<bundles_post_ra>
// kernel: tpu_custom_call.1
= control target key start
LH: loop header
LB: loop body
LE: loop exit
PB: predicated region body
PF: predicated region fallthrough
CT: control target
= control target key end

     0   :  { %vm84_vm0 = vcmask 254976   ;;  %s230_s0 = inlined_call_operand.vmem [shape: f32[8,2,32], index: 0, kind: input, shape index: {}]   ;;  %s231_s1 = inlined_call_operand.vmem [shape: f32[1000,1,32], index: 1, kind: input, shape index: {}]   ;;  %s232_s2 = inlined_call_operand.hbm [shape: f32[8,2,32], index: 2, kind: output, shape index: {}]  }
   0x1   :  { %v12_v0 = vld [vmem:[%s230_s0] sm:$0x3]  ;;  %v13_v3 = vld [vmem:[%s230_s0 + $0x2] sm:$0x3]  ;;  %v14_v5 = vld [vmem:[%s230_s0 + $0x4] sm:$0x3] }
   0x2   :  { %v109_v1 = vld [vmem:[%s231_s1] ss:$0 sm:$0xff]  ;;  %v110_v4 = vld [vmem:[%s231_s1 + $0x1] ss:$0 sm:$0xff]  ;;  %v111_v7 = vld [vmem:[%s231_s1 + $0x2] ss:$0 sm:$0xff] }
   0x3   :  { %v76_v2 = vadd.f32 %v109_v1, %v12_v0  ;;  %v77_v6 = vadd.f32 %v110_v4, %v13_v3  ;;  %v15_v8 = vld [vmem:[%s230_s0 + $0x6] sm:$0x3]  ;;  %v112_v9 = vld [vmem:[%s231_s1 + $0x3] ss:$0 sm:$0xff]  ;;  %v78_v10 = vadd.f32 %v111_v7, %v14_v5  ;;  %v16_v12 = vld [vmem:[%s230_s0 + $0x8] sm:$0x3] }
   0x4   :  { %v79_v11 = vadd.f32 %v112_v9, %v15_v8  ;;  %v113_v13 = vld [vmem:[%s231_s1 + $0x4] ss:$0 sm:$0xff]  ;;  %v17_v14 = vld [vmem:[%s230_s0 + $0xa] sm:$0x3]  ;;  %v114_v16 = vld [vmem:[%s231_s1 + $0x5] ss:$0 sm:$0xff] }
   0x5   :  { %85 = vst.msk [vmem:[#allocation2] sm:$0x3] %vm84_vm0, %v76_v2  ;;  %86 = vst.msk [vmem:[#allocation2 + $0x2] sm:$0x3] %vm84_vm0, %v77_v6  ;;  %v80_v15 = vadd.f32 %v113_v13, %v16_v12  ;;  %v18_v17 = vld [vmem:[%s230_s0 + $0xc] sm:$0x3]  ;;  %v81_v19 = vadd.f32 %v114_v16, %v17_v14 }
   0x6   :  { %v115_v18 = vld [vmem:[%s231_s1 + $0x6] ss:$0 sm:$0xff]  ;;  %87 = vst.msk [vmem:[#allocation2 + $0x4] sm:$0x3] %vm84_vm0, %v78_v10  ;;  %88 = vst.msk [vmem:[#allocation2 + $0x6] sm:$0x3] %vm84_vm0, %v79_v11 }
   0x7   :  { %v82_v20 = vadd.f32 %v115_v18, %v18_v17  ;;  %v19_v21 = vld [vmem:[%s230_s0 + $0xe] sm:$0x3]  ;;  %v116_v22 = vld [vmem:[%s231_s1 + $0x7] ss:$0 sm:$0xff] }
   0x8   :  { %7 = vsyncpa [#allocation3], 0  ;;  %89 = vst.msk [vmem:[#allocation2 + $0x8] sm:$0x3] %vm84_vm0, %v80_v15  ;;  %v83_v23 = vadd.f32 %v116_v22, %v19_v21  ;;  %s144_s13 = smov [#allocation2]  }
   0x9   :  { %s98_s14 = sshll.u32 %s144_s13, 4  ;;  %90 = vst.msk [vmem:[#allocation2 + $0xa] sm:$0x3] %vm84_vm0, %v81_v19  ;;  %91 = vst.msk [vmem:[#allocation2 + $0xc] sm:$0x3] %vm84_vm0, %v82_v20  ;;  %s99_s14 = int_to_ptr.vmem [resolvable:$true] %s98_s14 }
   0xa   :  { %92 = vst.msk [vmem:[#allocation2 + $0xe] sm:$0x3] %vm84_vm0, %v83_v23  ;;  %s120_s15 = scalar_lea.vmem %s99_s14, 256  ;;  %p125_p1 = scmp.lt.s32.totalorder %s99_s14, %s99_s14 }
   0xb   :  { %p121_p0 = scmp.ne.s32.totalorder %s99_s14, %s120_s15  ;;  %p126_p2 = scmp.lt.s32.totalorder %s120_s15, %s120_s15 }
   0xd   :  { %p127_p3 = por %p126_p2, %p125_p1 }
   0xf   :  { %p128_p4 = pnand %p127_p3, %p121_p0 }
  0x11   :  { %131 = shalt.err (!%p128_p4)
}
  0x12   :  { %s132_s16 = scalar_lea.hbm %s232_s2, 256 }
  0x13   :  { %p133_p5 = scmp.ne.s32.totalorder %s232_s2, %s132_s16  ;;  %p136_p6 = scmp.lt.u32.totalorder %s132_s16, %s232_s2 }
  0x15   :  { %p138_p7 = pnand %p136_p6, %p133_p5 }
  0x17   :  { %141 = shalt.err (!%p138_p7)
}
  0x18   :  { %s145_s21 = smov 32   ;;  %s146_s22 = smov 2  }
  0x19   :  { %104 = dma.vmem_to_hbm [thread:$0]  %s99_s14, 256, %s232_s2, [#allocation3], %s145_s21, %s145_s21, %s146_s22  }
  0x1a   :  { %142 = dma.done.wait [#allocation3], 256  }
  0x1b   :  { %143 = vsyncadd [#allocation3], 4294967040 }
  0x1c   :  { %108 = vsyncpa [#allocation3], 1 }

</bundles_post_ra>
